<compile_context>
chip_gen: v5e
topology: v5e:2x2
jax: 0.10.0
libtpu: 0.0.40
codegen_flags: <defaults>
</compile_context>

<pallas_src>
import math

import jax
import jax.numpy as jnp
import numpy as np
from jax.experimental import pallas as pl
from jax.experimental.pallas import tpu as pltpu

_LOG10000 = math.log(10000.0)


def _sublane(itemsize: int) -> int:
    return 8 if itemsize >= 4 else 16


def _vmem_limit_bytes(*tile_bytes: int) -> int:
    # 2x for double-buffering of every pipelined operand, 1.5x + 2 MiB headroom for
    # compiler temporaries; floor at 16 MiB (safe on every generation).
    need = 2 * sum(tile_bytes)
    return max(int(need * 1.5) + (2 << 20), 16 << 20)


# ---------------------------------------------------------------------------------
# Path A (main): keep (B, T, D) layout, compute PE in-kernel from a (2, D) constant
# table (row 0 = inv_freq, row 1 = phase). Lane-dense when D % 128 == 0.
# ---------------------------------------------------------------------------------
def _make_tiled_kernel(d_model: int, tile_t: int):
    xscale = math.sqrt(d_model)

    def kernel(x_ref, c_ref, o_ref):
        x = x_ref[...]
        tt = x_ref.shape[1]
        c = c_ref[...]                         # (2, D) f32, same block every grid step
        inv_freq = c[0:1, :]                   # (1, D)
        phase = c[1:2, :]                      # (1, D)

        t0 = (pl.program_id(1) * tile_t).astype(jnp.float32)
        pos = jax.lax.broadcasted_iota(jnp.float32, (tt, d_model), 0) + t0
        # One transcendental per element: cos folded into sin via the per-lane phase.
        pe = jnp.sin(pos * inv_freq + phase).astype(x.dtype)

        o_ref[...] = (x * jnp.asarray(xscale, x.dtype) + pe[None, :, :]).astype(o_ref.dtype)

    return kernel


def _forward_tiled(x, *, block_bytes, donate_x):
    B, T, D = x.shape
    itemsize = jnp.dtype(x.dtype).itemsize
    sub = _sublane(itemsize)

    row_bytes = D * itemsize
    rows = max(sub, ((block_bytes // max(1, row_bytes)) // sub) * sub)
    if rows >= T:
        tile_t = T
        tile_b = max(1, min(B, block_bytes // max(1, T * row_bytes)))
    else:
        tile_t = rows
        tile_b = 1

    grid = (pl.cdiv(B, tile_b), pl.cdiv(T, tile_t))

    # Feature constants, built once outside the kernel: row 0 = inv_freq, row 1 = phase.
    j = np.arange(D)
    two_k = (j - (j % 2)).astype(np.float32)
    inv_freq = np.exp(two_k * (-_LOG10000 / D))
    phase = np.where(j % 2 == 0, 0.0, math.pi / 2.0).astype(np.float32)
    consts = jnp.asarray(np.stack([inv_freq, phase], axis=0))  # (2, D) f32

    tile_bytes = tile_b * tile_t * D * itemsize
    kernel = _make_tiled_kernel(D, tile_t)

    return pl.pallas_call(
        kernel,
        out_shape=jax.ShapeDtypeStruct((B, T, D), x.dtype),
        grid_spec=pltpu.PrefetchScalarGridSpec(
            num_scalar_prefetch=0,
            grid=grid,
            in_specs=[
                pl.BlockSpec((tile_b, tile_t, D), lambda b, t: (b, t, 0)),
                pl.BlockSpec((2, D), lambda b, t: (0, 0)),
            ],
            out_specs=pl.BlockSpec((tile_b, tile_t, D), lambda b, t: (b, t, 0)),
        ),
        compiler_params=pltpu.CompilerParams(
            dimension_semantics=("parallel", "parallel"),
            vmem_limit_bytes=_vmem_limit_bytes(tile_bytes, tile_bytes, 2 * D * 4),
        ),
        input_output_aliases=({0: 0} if donate_x else {}),
    )(x, consts)


# ---------------------------------------------------------------------------------
# Path B (lane-dense, D % 128 != 0 but (T*D) % 128 == 0): reshape to (B, T*D/128, 128)
# and stream a tiny precomputed PE slab so all stores are unmasked full-lane stores.
# ---------------------------------------------------------------------------------
def _make_flat_kernel(xscale: float):
    def kernel(x_ref, pe_ref, o_ref):
        x = x_ref[...]
        pe = pe_ref[...].astype(x.dtype)       # (tile_rows, 128)
        o_ref[...] = (x * jnp.asarray(xscale, x.dtype) + pe[None, :, :]).astype(o_ref.dtype)

    return kernel


def _forward_flat(x, *, block_bytes, donate_x):
    B, T, D = x.shape
    itemsize = jnp.dtype(x.dtype).itemsize
    sub = _sublane(itemsize)
    rows = (T * D) // 128
    x3 = x.reshape(B, rows, 128)

    # PE table (T, D) -> lane-dense (rows, 128) f32, built once per call with plain XLA
    # ops (T*D*4 bytes, tiny for D < 128 models).
    pos = jnp.arange(T, dtype=jnp.float32)[:, None]
    jf = jnp.arange(D)
    two_k = (jf - (jf % 2)).astype(jnp.float32)[None, :]
    phase = jnp.where((jf % 2) == 0, 0.0, math.pi / 2.0)[None, :]
    pe = jnp.sin(pos * jnp.exp(two_k * (-_LOG10000 / D)) + phase)      # (T, D) f32
    pe = pe.reshape(rows, 128)

    # Tile rows; prefer keeping the full batch in each block so the PE tile is read once.
    tr = block_bytes // max(1, B * 128 * itemsize)
    if tr >= rows or rows < sub:
        tile_rows = rows
    else:
        tile_rows = min(rows, max(sub, (tr // sub) * sub))
    tile_b = B
    if B > 1 and B * tile_rows * 128 * itemsize > 4 * block_bytes:
        tile_b = max(1, block_bytes // (tile_rows * 128 * itemsize))

    grid = (pl.cdiv(B, tile_b), pl.cdiv(rows, tile_rows))
    x_bytes = tile_b * tile_rows * 128 * itemsize
    pe_bytes = tile_rows * 128 * 4

    out3 = pl.pallas_call(
        _make_flat_kernel(math.sqrt(D)),
        out_shape=jax.ShapeDtypeStruct((B, rows, 128), x.dtype),
        grid_spec=pltpu.PrefetchScalarGridSpec(
            num_scalar_prefetch=0,
            grid=grid,
            in_specs=[
                pl.BlockSpec((tile_b, tile_rows, 128), lambda b, r: (b, r, 0)),
                pl.BlockSpec((tile_rows, 128), lambda b, r: (r, 0)),
            ],
            out_specs=pl.BlockSpec((tile_b, tile_rows, 128), lambda b, r: (b, r, 0)),
        ),
        compiler_params=pltpu.CompilerParams(
            dimension_semantics=("parallel", "parallel"),
            vmem_limit_bytes=_vmem_limit_bytes(x_bytes, x_bytes, pe_bytes),
        ),
        input_output_aliases=({0: 0} if donate_x else {}),
    )(x3, pe)
    return out3.reshape(B, T, D)


def positional_encoding(
    x: jax.Array,
    dropout_rate: float = 0.0,
    *,
    training: bool = False,
    block_bytes: int = 4 * 1024 * 1024,
    donate_x: bool = False,
) -> jax.Array:
    """x: (batch, time, d_model). Returns dropout(x * sqrt(d_model) + PE[:time])."""
    B, T, D = x.shape
    assert D % 2 == 0, "d_model must be even"
    if training and dropout_rate > 0.0:
        # TODO(synk): implement training-mode dropout with pltpu.prng_seed / stateful_bernoulli.
        raise NotImplementedError("dropout only supported in eval mode (identity)")
    if D % 128 != 0 and (T * D) % 128 == 0:
        return _forward_flat(x, block_bytes=block_bytes, donate_x=donate_x)
    # TODO(synk): if D % 128 != 0 and T*D % 128 != 0 the output stores stay lane-masked.
    return _forward_tiled(x, block_bytes=block_bytes, donate_x=donate_x)


def _reference(x: np.ndarray) -> np.ndarray:
    """Pure-numpy mirror of the PyTorch forward (dropout in eval mode)."""
    B, T, D = x.shape
    pe = np.zeros((T, D), dtype=np.float32)
    position = np.arange(0, T, dtype=np.float32)[:, None]
    div_term = np.exp(np.arange(0, D, 2, dtype=np.float32) * -(math.log(10000.0) / D))
    pe[:, 0::2] = np.sin(position * div_term)
    pe[:, 1::2] = np.cos(position * div_term)
    return x * math.sqrt(D) + pe[None]


if __name__ == "__main__":
    key = jax.random.PRNGKey(0)

    # Small d_model -> lane-dense flat path.
    B, T, D = 2, 8, 32
    x = jax.random.normal(key, (B, T, D), dtype=jnp.float32)
    out = jax.block_until_ready(positional_encoding(x, dropout_rate=0.1))
    np.testing.assert_allclose(np.asarray(out), _reference(np.asarray(x)), rtol=1e-5, atol=1e-5)

    # Standard lane-dense d_model with a multi-tile grid (main path).
    B2, T2, D2 = 2, 64, 128
    x2 = jax.random.normal(jax.random.PRNGKey(1), (B2, T2, D2), dtype=jnp.float32)
    out2 = jax.block_until_ready(positional_encoding(x2, block_bytes=8 * 128 * 4))
    np.testing.assert_allclose(np.asarray(out2), _reference(np.asarray(x2)), rtol=1e-5, atol=1e-5)

    # Awkward shapes (neither D nor T*D a multiple of 128) -> masked-store fallback.
    B3, T3, D3 = 2, 5, 30
    x3 = jax.random.normal(jax.random.PRNGKey(2), (B3, T3, D3), dtype=jnp.float32)
    out3 = jax.block_until_ready(positional_encoding(x3))
    np.testing.assert_allclose(np.asarray(out3), _reference(np.asarray(x3)), rtol=1e-5, atol=1e-5)

    print("KERNEL_OK")
</pallas_src>

<mosaic_0001>
module attributes {stable_mosaic.version = 11 : i64} {
  func.func @kernel(%arg0: i32, %arg1: i32, %arg2: memref<2x2x128xf32, #tpu.memory_space<vmem>>, %arg3: memref<2x128xf32, #tpu.memory_space<vmem>>, %arg4: memref<2x2x128xf32, #tpu.memory_space<vmem>>) attributes {dimension_semantics = [#tpu.dimension_semantics<parallel>, #tpu.dimension_semantics<parallel>], iteration_bounds = array<i64: 1, 1>, scalar_prefetch = 0 : i64, scratch_operands = 0 : i64, tpu.core_type = #tpu.core_type<tc>, window_params = [{transform_indices = @transform_0, window_bounds = array<i64: 2, 2, 128>}, {transform_indices = @transform_1, window_bounds = array<i64: 2, 128>}, {transform_indices = @transform_2, window_bounds = array<i64: 2, 2, 128>}]} {
    %c0 = arith.constant 0 : index
    %c0_0 = arith.constant 0 : index
    %c0_1 = arith.constant 0 : index
    %0 = vector.load %arg2[%c0, %c0_0, %c0_1] : memref<2x2x128xf32, #tpu.memory_space<vmem>>, vector<2x2x128xf32>
    %c0_2 = arith.constant 0 : index
    %c0_3 = arith.constant 0 : index
    %1 = vector.load %arg3[%c0_2, %c0_3] : memref<2x128xf32, #tpu.memory_space<vmem>>, vector<2x128xf32>
    %cst = arith.constant 5.65685415 : f32
    %2 = vector.broadcast %cst : f32 to vector<2x2x128xf32>
    %3 = arith.mulf %0, %2 : vector<2x2x128xf32>
    %4 = vector.shape_cast %1 : vector<2x128xf32> to vector<1x2x128xf32>
    %5 = vector.broadcast %4 : vector<1x2x128xf32> to vector<2x2x128xf32>
    %6 = arith.addf %3, %5 : vector<2x2x128xf32>
    %c0_4 = arith.constant 0 : index
    %c0_5 = arith.constant 0 : index
    %c0_6 = arith.constant 0 : index
    %7 = vector.load %arg4[%c0_4, %c0_5, %c0_6] : memref<2x2x128xf32, #tpu.memory_space<vmem>>, vector<2x2x128xf32>
    tpu.vector_store %arg4[%c0_4, %c0_5, %c0_6], %6 {strides = array<i32>} : memref<2x2x128xf32, #tpu.memory_space<vmem>>, vector<2x2x128xf32>,
    return
  }
  func.func @transform_0(%arg0: i32, %arg1: i32) -> (i32, i32, i32) {
    %c0_i32 = arith.constant 0 : i32
    %c0_i32_0 = arith.constant 0 : i32
    return %arg0, %arg1, %c0_i32 : i32, i32, i32
  }
  func.func @transform_1(%arg0: i32, %arg1: i32) -> (i32, i32) {
    %c0_i32 = arith.constant 0 : i32
    %c0_i32_0 = arith.constant 0 : i32
    return %arg1, %c0_i32 : i32, i32
  }
  func.func @transform_2(%arg0: i32, %arg1: i32) -> (i32, i32, i32) {
    %c0_i32 = arith.constant 0 : i32
    %c0_i32_0 = arith.constant 0 : i32
    return %arg0, %arg1, %c0_i32 : i32, i32, i32
  }
}

</mosaic_0001>

<bundles_post_ra>
// kernel: tpu_custom_call.1
= control target key start
LH: loop header
LB: loop body
LE: loop exit
PB: predicated region body
PF: predicated region fallthrough
CT: control target
= control target key end

     0   :  { %7 = vsyncpa [#allocation3], 0  ;;  %s183_s0 = inlined_call_operand.hbm [shape: f32[2,2,128], index: 0, kind: input, shape index: {}]   ;;  %s184_s1 = inlined_call_operand.hbm [shape: f32[2,128], index: 1, kind: input, shape index: {}]   ;;  %s185_s2 = inlined_call_operand.hbm [shape: f32[2,2,128], index: 2, kind: output, shape index: {}]  }
   0x1   :  { %8 = vsyncpa [#allocation6], 0 }
   0x2   :  { %9 = vsyncpa [#allocation4], 0  ;;  %s14_s11 = sshll.u32 %s183_s0, 4  ;;  %s154_s12 = smov [#allocation2]   ;;  %s15_s11 = int_to_ptr.hbm [resolvable:$true] %s14_s11 }
   0x3   :  { %s16_s13 = sshll.u32 %s154_s12, 4  ;;  %s28_s16 = sshll.u32 %s184_s1, 4  ;;  %s17_s13 = int_to_ptr.vmem [resolvable:$true] %s16_s13  ;;  %s29_s16 = int_to_ptr.hbm [resolvable:$true] %s28_s16 }
   0x4   :  { %s155_s17 = smov 32   ;;  %s156_s18 = smov 2  }
   0x5   :  { %22 = dma.hbm_to_vmem [thread:$0]  %s15_s11, 64, %s17_s13, [#allocation3], %s155_s17, %s155_s17, %s156_s18  }
   0x6   :  { %s157_s19 = smov [#allocation5]  }
   0x7   :  { %s30_s20 = sshll.u32 %s157_s19, 4  ;;  %s31_s20 = int_to_ptr.vmem [resolvable:$true] %s30_s20 }
   0x8   :  { %33 = dma.hbm_to_vmem [thread:$0]  %s29_s16, 32, %s31_s20, [#allocation6]  }
   0x9   :  { %148 = dma.done.wait [#allocation3], 64  }
   0xa   :  { %149 = vsyncadd [#allocation3], 4294967232 }
   0xb   :  { %150 = dma.done.wait [#allocation6], 32  }
   0xc   :  { %151 = vsyncadd [#allocation6], 4294967264  ;;  %v42_v0 = vld [vmem:[#allocation2] sm:$0x3]  ;;  %v44_v1 = vld [vmem:[#allocation5] sm:$0x3] }
   0xd   :  { %v43_v2 = vld [vmem:[#allocation2 + $0x2] sm:$0x3]  ;;  %v45_v3 = vmul.f32 5.656854, %v42_v0  ;;  %s158_s0 = smov [#allocation7]   ;;  %s57_s23 = sshll.u32 %s185_s2, 4  ;;  %s58_s23 = int_to_ptr.hbm [resolvable:$true] %s57_s23 }
   0xe   :  { %v46_v4 = vmul.f32 5.656854, %v43_v2  ;;  %s55_s21 = sshll.u32 %s158_s0, 4  ;;  %s56_s21 = int_to_ptr.vmem [resolvable:$true] %s55_s21 }
   0xf   :  { %v47_v5 = vadd.f32 %v45_v3, %v44_v1 }
  0x10   :  { %v48_v6 = vadd.f32 %v46_v4, %v44_v1 }
  0x11   :  { %49 = vst [vmem:[#allocation7] sm:$0x3] %v47_v5 }
  0x12   :  { %50 = vst [vmem:[#allocation7 + $0x2] sm:$0x3] %v48_v6 }
  0x13   :  { %63 = dma.vmem_to_hbm [thread:$0]  %s56_s21, 64, %s58_s23, [#allocation4], %s155_s17, %s155_s17, %s156_s18  }
  0x14   :  { %152 = dma.done.wait [#allocation4], 64  }
  0x15   :  { %153 = vsyncadd [#allocation4], 4294967232 }
  0x16   :  { %68 = vsyncpa [#allocation3], 1 }
  0x17   :  { %69 = vsyncpa [#allocation6], 1 }
  0x18   :  { %70 = vsyncpa [#allocation4], 1 }

</bundles_post_ra>
